<compile_context>
chip_gen: v7x
topology: tpu7x:2x2x1
jax: 0.10.0
libtpu: 0.0.40
codegen_flags: <defaults>
</compile_context>

<pallas_src>
import functools

import jax
import jax.numpy as jnp
from jax.experimental import pallas as pl
from jax.experimental.pallas import tpu as pltpu


def _classifier_kernel(x_ref, wt_ref, b_ref, o_ref):
    # x_ref: (TM, H) streamed tile; wt_ref: (H, Cp) resident; b_ref: (1, Cp); o_ref: (TM, Cp)
    acc = jnp.dot(x_ref[...], wt_ref[...], preferred_element_type=jnp.float32)
    o_ref[...] = (acc + b_ref[...]).astype(o_ref.dtype)


def _round_up(x, m):
    return ((x + m - 1) // m) * m


@functools.partial(jax.jit, static_argnames=("tm",))
def classifier_forward(encodings, weight, bias, *, tm=None):
    """Linear classifier forward (logits = encodings @ weight.T + bias).

    Args:
      encodings: (batch, hidden) float32 / bfloat16
      weight:    (nb_classes, hidden)  (PyTorch nn.Linear layout)
      bias:      (nb_classes,)
    Returns:
      logits: (batch, nb_classes), dtype of `encodings`
    """
    batch, hidden = encodings.shape
    nb_classes = weight.shape[0]
    itemsize = jnp.dtype(encodings.dtype).itemsize

    # Sublane granularity: 8 rows for 32-bit, 16 for bf16 (sublane-packed).
    sub = 16 if encodings.dtype == jnp.bfloat16 else 8

    # Minimum lane padding of the class dim -> unmasked (lane-dense) stores.
    c_pad = _round_up(nb_classes, 128)

    if tm is None:
        # Cap tile rows so the two double-buffered x tiles stay <= ~8 MiB
        # (fits v5e's 16 MiB default scoped VMEM next to the resident weight
        # and the double-buffered output tiles).
        x_budget = 8 * 1024 * 1024
        cap = max(sub, (x_budget // (2 * hidden * itemsize)) // sub * sub)
        cap = min(cap, 512)
        # Balance tiles (no pathological padding for batch just over a tile),
        # and prefer >= 2 tiles when big enough so v7x's 2nd TC is used.
        n_tiles = pl.cdiv(batch, cap)
        if batch > 2 * sub:
            n_tiles = max(n_tiles, 2)
        tm = _round_up(pl.cdiv(batch, n_tiles), sub)
    tm = max(sub, _round_up(tm, sub))

    # No batch padding: Pallas masks the ragged trailing block.
    grid = (pl.cdiv(batch, tm),)

    # Pre-transpose the weight once (grid-invariant, stays VMEM-resident) so
    # the kernel never needs a per-step XLU transpose.
    w_t = weight.T                       # (hidden, nb_classes)
    b2 = bias.reshape(1, nb_classes)
    if c_pad != nb_classes:
        w_t = jnp.pad(w_t, ((0, 0), (0, c_pad - nb_classes)))
        b2 = jnp.pad(b2, ((0, 0), (0, c_pad - nb_classes)))

    cost = pl.CostEstimate(
        flops=2 * batch * hidden * c_pad,
        transcendentals=0,
        bytes_accessed=(
            encodings.size * itemsize
            + w_t.size * jnp.dtype(w_t.dtype).itemsize
            + b2.size * jnp.dtype(b2.dtype).itemsize
            + batch * c_pad * itemsize
        ),
    )

    out = pl.pallas_call(
        _classifier_kernel,
        out_shape=jax.ShapeDtypeStruct((batch, c_pad), encodings.dtype),
        grid_spec=pl.GridSpec(
            grid=grid,
            in_specs=[
                # x: tiled over batch -> double-buffered pipelined DMA.
                pl.BlockSpec((tm, hidden), lambda i: (i, 0)),
                # weight & bias: constant index_map -> single buffer (VMEM headroom).
                pl.BlockSpec((hidden, c_pad), lambda i: (0, 0),
                             pipeline_mode=pl.Buffered(1)),
                pl.BlockSpec((1, c_pad), lambda i: (0, 0),
                             pipeline_mode=pl.Buffered(1)),
            ],
            out_specs=pl.BlockSpec((tm, c_pad), lambda i: (i, 0)),
        ),
        compiler_params=pltpu.CompilerParams(
            # Independent batch rows -> shard grid across TensorCores (v7x).
            dimension_semantics=("parallel",),
        ),
        cost_estimate=cost,
    )(encodings, w_t, b2)

    # Note: for vocab-sized class counts, add an N grid axis tiling c_pad
    # instead of keeping the whole (hidden, c_pad) weight VMEM-resident.
    if c_pad != nb_classes:
        out = out[:, :nb_classes]
    return out


if __name__ == "__main__":
    # Small shapes consistent with the module: batch=8, hidden=32, nb_classes=16.
    batch, hidden, nb_classes = 8, 32, 16

    key = jax.random.PRNGKey(0)
    k_x, k_w, k_b = jax.random.split(key, 3)

    encodings = jax.random.normal(k_x, (batch, hidden), dtype=jnp.float32)
    # PyTorch nn.Linear-style shapes: W (out, in), b (out,)
    bound = 1.0 / (hidden ** 0.5)
    weight = jax.random.uniform(k_w, (nb_classes, hidden), jnp.float32, -bound, bound)
    bias = jax.random.uniform(k_b, (nb_classes,), jnp.float32, -bound, bound)

    logits = classifier_forward(encodings, weight, bias)
    jax.block_until_ready(logits)

    # Reference check against plain JAX
    ref = encodings @ weight.T + bias
    assert logits.shape == (batch, nb_classes)
    assert jnp.allclose(logits, ref, atol=1e-5, rtol=1e-5)

    print("KERNEL_OK")
</pallas_src>

<mosaic_0001>
module attributes {stable_mosaic.version = 11 : i64} {
  func.func @_classifier_kernel(%arg0: i32, %arg1: memref<8x32xf32, #tpu.memory_space<vmem>>, %arg2: memref<32x128xf32, #tpu.memory_space<vmem>>, %arg3: memref<1x128xf32, #tpu.memory_space<vmem>>, %arg4: memref<8x128xf32, #tpu.memory_space<vmem>>) attributes {dimension_semantics = [#tpu.dimension_semantics<parallel>], iteration_bounds = array<i64: 1>, scalar_prefetch = 0 : i64, scratch_operands = 0 : i64, tpu.core_type = #tpu.core_type<tc>, window_params = [{transform_indices = @transform_0, window_bounds = array<i64: 8, 32>}, {pipeline_mode = #tpu.pipeline_mode<synchronous>, transform_indices = @transform_1, window_bounds = array<i64: 32, 128>}, {pipeline_mode = #tpu.pipeline_mode<synchronous>, transform_indices = @transform_2, window_bounds = array<i64: 1, 128>}, {transform_indices = @transform_3, window_bounds = array<i64: 8, 128>}]} {
    %c0 = arith.constant 0 : index
    %c0_0 = arith.constant 0 : index
    %0 = vector.load %arg1[%c0, %c0_0] : memref<8x32xf32, #tpu.memory_space<vmem>>, vector<8x32xf32>
    %c0_1 = arith.constant 0 : index
    %c0_2 = arith.constant 0 : index
    %1 = vector.load %arg2[%c0_1, %c0_2] : memref<32x128xf32, #tpu.memory_space<vmem>>, vector<32x128xf32>
    %cst = arith.constant dense<0.000000e+00> : vector<8x128xf32>
    %2 = tpu.matmul %0, %1, %cst {dimension_numbers = #tpu.dot_dimension_numbers<[1], [0], [0], [1], [0, 0, 1, 1], [], []>} : vector<8x32xf32>, vector<32x128xf32>, vector<8x128xf32> -> vector<8x128xf32>
    %c0_3 = arith.constant 0 : index
    %c0_4 = arith.constant 0 : index
    %3 = vector.load %arg3[%c0_3, %c0_4] : memref<1x128xf32, #tpu.memory_space<vmem>>, vector<1x128xf32>
    %4 = vector.broadcast %3 : vector<1x128xf32> to vector<8x128xf32>
    %5 = arith.addf %2, %4 : vector<8x128xf32>
    %c0_5 = arith.constant 0 : index
    %c0_6 = arith.constant 0 : index
    %6 = vector.load %arg4[%c0_5, %c0_6] : memref<8x128xf32, #tpu.memory_space<vmem>>, vector<8x128xf32>
    tpu.vector_store %arg4[%c0_5, %c0_6], %5 {strides = array<i32>} : memref<8x128xf32, #tpu.memory_space<vmem>>, vector<8x128xf32>,
    return
  }
  func.func @transform_0(%arg0: i32) -> (i32, i32) {
    %c0_i32 = arith.constant 0 : i32
    %c0_i32_0 = arith.constant 0 : i32
    return %arg0, %c0_i32 : i32, i32
  }
  func.func @transform_1(%arg0: i32) -> (i32, i32) {
    %c0_i32 = arith.constant 0 : i32
    %c0_i32_0 = arith.constant 0 : i32
    %c0_i32_1 = arith.constant 0 : i32
    return %c0_i32, %c0_i32_0 : i32, i32
  }
  func.func @transform_2(%arg0: i32) -> (i32, i32) {
    %c0_i32 = arith.constant 0 : i32
    %c0_i32_0 = arith.constant 0 : i32
    %c0_i32_1 = arith.constant 0 : i32
    return %c0_i32, %c0_i32_0 : i32, i32
  }
  func.func @transform_3(%arg0: i32) -> (i32, i32) {
    %c0_i32 = arith.constant 0 : i32
    %c0_i32_0 = arith.constant 0 : i32
    return %arg0, %c0_i32 : i32, i32
  }
}

</mosaic_0001>

<bundles_post_ra>
// kernel: classifier_forward.1
= control target key start
LH: loop header
LB: loop body
LE: loop exit
PB: predicated region body
PF: predicated region fallthrough
CT: control target
= control target key end

     0   :  { %v168_v3 = vmov 0.0|0.0   ;;  %vm169_vm0 = vmmov 0   ;;  %v170_v6 = vmov 0.0   ;;  %s222_s0 = inlined_call_operand.vmem [shape: f32[8,32], index: 0, kind: input, shape index: {}]   ;;  %s223_s1 = inlined_call_operand.vmem [shape: f32[32,128], index: 1, kind: input, shape index: {}]   ;;  %s224_s2 = inlined_call_operand.vmem [shape: f32[1,128], index: 2, kind: input, shape index: {}]   ;;  %s225_s3 = inlined_call_operand.hbm [shape: f32[8,128], index: 3, kind: output, shape index: {}]  }
   0x1   :  { %v16_v0 = vld [vmem:[%s223_s1] sm:$0xff]  ;;  %v17_v1 = vld [vmem:[%s223_s1 + $0x8] sm:$0xff]  ;;  %v18_v2 = vld [vmem:[%s223_s1 + $0x10] sm:$0xff]  ;;  %134 = vmatprep.subr.bf16.mxu0 %v168_v3  ;;  %131 = vmatprep.mubr.msk.f32.mxu0 %vm169_vm0, %v170_v6 }
   0x2   :  { %v135_v4 = vpack.c.bf16 %v17_v1, %v16_v0  ;;  %v19_v5 = vld [vmem:[%s223_s1 + $0x18] sm:$0xff] }
   0x3   :  { %8 = vsyncpa [#allocation3], 0  ;;  %v138_v7 = vpack.c.bf16 %v19_v5, %v18_v2  ;;  %v15_v8 = vld [vmem:[%s222_s0] sm:$0xff]  ;;  %vm27_vm1 = vcmask 261120   ;;  %s171_s24 = smov [#allocation2]  }
   0x4   :  { %136 = vmatpush3.bf16.msra.mxu0 %v135_v4  ;;  %v116_v9 = vld [vmem:[%s224_s2] ss:$0 sm:$0xff]  ;;  %s108_s1 = sshll.u32 %s171_s24, 4  ;;  %s109_s1 = int_to_ptr.vmem [resolvable:$true] %s108_s1 }
   0x5   :  { %137 = vmatprep.subr.bf16.mxu0 %v168_v3  ;;  %s144_s25 = scalar_lea.vmem %s109_s1, 128  ;;  %p149_p1 = scmp.lt.s32.totalorder %s109_s1, %s109_s1 }
   0x6   :  { %p145_p0 = scmp.ne.s32.totalorder %s109_s1, %s144_s25  ;;  %p150_p2 = scmp.lt.s32.totalorder %s144_s25, %s144_s25 }
   0x8   :  { %139 = vmatpush3.bf16.msra.mxu0 %v138_v7  ;;  %p151_p3 = por %p150_p2, %p149_p1 }
   0xa   :  { %p152_p4 = pnand %p151_p3, %p145_p0 }
   0xb   :  { %132 = vmatmul.mubr.msk.f32.vlgmr.msra.gmra.mrb[0].mxu0 %vm27_vm1, %v15_v8 }
  0xde   :  { %v97_v10 = vpop.f32.mrb[0].mxu0 }
  0xdf   :  { %v98_v11 = vadd.f32 %v116_v9, %v97_v10  ;;  %v133_v12 = vpop.f32.mrb[1].mxu0 }
  0xe1   :  { %101 = vst [vmem:[#allocation2] sm:$0xff] %v98_v11 }
  0xe2   :  { %155 = shalt.err (!%p152_p4)
}
  0xe3   :  { %s156_s27 = scalar_lea.hbm %s225_s3, 128 }
  0xe4   :  { %p157_p5 = scmp.ne.s32.totalorder %s225_s3, %s156_s27  ;;  %p160_p6 = scmp.lt.u32.totalorder %s156_s27, %s225_s3 }
  0xe6   :  { %p162_p7 = pnand %p160_p6, %p157_p5 }
  0xe8   :  { %165 = shalt.err (!%p162_p7)
}
  0xe9   :  { %111 = dma.vmem_to_hbm [thread:$0]  %s109_s1, 128, %s225_s3, [#allocation3]  }
  0xea   :  { %166 = dma.done.wait [#allocation3], 128  }
  0xeb   :  { %167 = vsyncadd [#allocation3], 4294967168 }
  0xec   :  { %115 = vsyncpa [#allocation3], 1 }

</bundles_post_ra>
